<compile_context>
chip_gen: v7x
topology: tpu7x:2x2x1
jax: 0.10.0
libtpu: 0.0.40
codegen_flags: <defaults>
</compile_context>

<pallas_src>
import functools

import jax
import jax.numpy as jnp
from jax.experimental import pallas as pl
from jax.experimental.pallas import tpu as pltpu


def _round_up(n, m):
    return ((n + m - 1) // m) * m


# ---------------------------------------------------------------------------
# Parameter packing: one lane-dense (rows, 128) VMEM buffer holding
#   rows [0, hidden)        : W1 in cols [0, d_in),  b1 in the last column
#   rows [r_w2, r_w2+d_out) : W2 in cols [0, hidden), b2 in the last column
# Row offsets are aligned to the dtype's sublane tile so static slices inside
# the kernel are free views (no per-step relayout copies).
# ---------------------------------------------------------------------------
def pack_params(w1, b1, w2, b2):
    hidden, d_in = w1.shape            # PyTorch layout: weight is (out, in)
    d_out, h2 = w2.shape
    assert h2 == hidden and b1.shape == (hidden,) and b2.shape == (d_out,)

    dtype = w1.dtype
    itemsize = jnp.dtype(dtype).itemsize
    row_align = 32 // itemsize         # 8 rows f32, 16 bf16, 32 int8/fp8
    width = max(128, _round_up(max(d_in, hidden) + 1, 128))   # lane-dense
    bcol = width - 1                   # bias column (never overlaps weights)

    r_w2 = _round_up(hidden, row_align)
    rows = _round_up(r_w2 + d_out, row_align)

    packed = jnp.zeros((rows, width), dtype)      # padding must stay exactly 0
    packed = packed.at[:hidden, :d_in].set(w1)
    packed = packed.at[:hidden, bcol].set(b1)
    packed = packed.at[r_w2:r_w2 + d_out, :hidden].set(w2)
    packed = packed.at[r_w2:r_w2 + d_out, bcol].set(b2)

    dims = dict(d_in=d_in, hidden=hidden, d_out=d_out, r_w2=r_w2, bcol=bcol)
    return packed, dims


# ---------------------------------------------------------------------------
# Kernel: fc1 -> ReLU -> fc3 in the transposed (batch-on-lanes) layout.
# Both matmuls hit the MXU with f32 accumulation; epilogues (bias add, ReLU)
# stay f32 (v5e has no bf16 VPU path).  Output store is lane-dense.
# ---------------------------------------------------------------------------
def _qnet_kernel(x_ref, p_ref, o_ref, *, d_in, hidden, d_out, r_w2, bcol):
    # Static slices of the packed parameter buffer.
    w1 = p_ref[0:hidden, 0:d_in]                      # (H, D_in)
    b1 = p_ref[0:hidden, bcol:bcol + 1]               # (H, 1)     bias column
    w2 = p_ref[r_w2:r_w2 + d_out, 0:hidden]           # (D_out, H)
    b2 = p_ref[r_w2:r_w2 + d_out, bcol:bcol + 1]      # (D_out, 1)

    # x^T tile: (D_in, Btile), batch on the lane axis.
    xT = x_ref[...].astype(p_ref.dtype)

    # fc1 + ReLU: MXU in param dtype, f32 accumulate, f32 epilogue.
    h = jnp.dot(w1, xT, preferred_element_type=jnp.float32)        # (H, Btile)
    h = jnp.maximum(h + b1.astype(jnp.float32), 0.0)

    # fc3: same precision recipe; lane-dense (D_out, Btile) store.
    y = jnp.dot(w2, h.astype(p_ref.dtype), preferred_element_type=jnp.float32)
    o_ref[...] = (y + b2.astype(jnp.float32)).astype(o_ref.dtype)


# ---------------------------------------------------------------------------
# Wrappers
# ---------------------------------------------------------------------------
def _cost_estimate(b, dims, x_itemsize, out_itemsize, packed_nbytes):
    flops = 2 * b * (dims["d_in"] * dims["hidden"]
                     + dims["hidden"] * dims["d_out"])
    bytes_accessed = (b * dims["d_in"] * x_itemsize
                      + b * dims["d_out"] * out_itemsize
                      + packed_nbytes)
    return pl.CostEstimate(flops=flops, transcendentals=0,
                           bytes_accessed=bytes_accessed)


def _forward_no_grid(xT, packed, dims, out_dtype):
    """Whole problem resident in VMEM, no grid / pipeline machinery."""
    d_in, B = xT.shape
    kernel = functools.partial(_qnet_kernel, **dims)
    return pl.pallas_call(
        kernel,
        out_shape=jax.ShapeDtypeStruct((dims["d_out"], B), out_dtype),
        in_specs=[
            pl.BlockSpec(memory_space=pltpu.MemorySpace.VMEM),
            pl.BlockSpec(memory_space=pltpu.MemorySpace.VMEM),
        ],
        out_specs=pl.BlockSpec(memory_space=pltpu.MemorySpace.VMEM),
        cost_estimate=_cost_estimate(B, dims, xT.dtype.itemsize,
                                     jnp.dtype(out_dtype).itemsize,
                                     packed.nbytes),
    )(xT, packed)


def _forward_batch_tiled(xT, packed, dims, tile_b, out_dtype):
    """Huge-batch path: tile the lane (batch) axis only; axis is "parallel" so
    v7x's two TensorCores split the (even-length) grid.  Params use a constant
    index_map and stay VMEM-resident across tiles."""
    d_in, B = xT.shape
    d_out = dims["d_out"]
    kernel = functools.partial(_qnet_kernel, **dims)
    grid = (B // tile_b,)
    return pl.pallas_call(
        kernel,
        out_shape=jax.ShapeDtypeStruct((d_out, B), out_dtype),
        grid=grid,
        in_specs=[
            pl.BlockSpec((d_in, tile_b), lambda i: (0, i)),
            pl.BlockSpec(packed.shape, lambda i: (0, 0)),
        ],
        out_specs=pl.BlockSpec((d_out, tile_b), lambda i: (0, i)),
        compiler_params=pltpu.CompilerParams(
            dimension_semantics=("parallel",)),
        cost_estimate=_cost_estimate(B, dims, xT.dtype.itemsize,
                                     jnp.dtype(out_dtype).itemsize,
                                     packed.nbytes),
    )(xT, packed)


def linear_qnet_forward(x, packed, dims, *, block_b=8192):
    """Pallas forward: x (B, D_in) -> (B, D_out) (PyTorch semantics)."""
    B, d_in = x.shape
    assert d_in == dims["d_in"]
    out_dtype = x.dtype

    xT = x.T                                  # batch onto the lane axis
    if B <= block_b:
        yT = _forward_no_grid(xT, packed, dims, out_dtype)
        return yT.T

    # Even number of tiles (v7x dual-TC load balance), lanes 128-aligned.
    n_tiles = pl.cdiv(B, block_b)
    if n_tiles % 2:
        n_tiles += 1
    tile_b = _round_up(pl.cdiv(B, n_tiles), 128)
    b_pad = n_tiles * tile_b
    if b_pad != B:
        # Padded columns produce garbage (relu(b1)@w2 + b2); sliced off below.
        xT = jnp.pad(xT, ((0, 0), (0, b_pad - B)))
    yT = _forward_batch_tiled(xT, packed, dims, tile_b, out_dtype)
    return yT[:, :B].T


# ---------------------------------------------------------------------------
# Init / reference (PyTorch nn.Linear layout and init)
# ---------------------------------------------------------------------------
def init_params(key, input_dim, hidden_dim, output_dim, dtype=jnp.float32):
    """U(-1/sqrt(fan_in), 1/sqrt(fan_in)); weights in PyTorch (out, in) layout."""
    k1, k2, k3, k4 = jax.random.split(key, 4)
    lim1 = float(input_dim) ** -0.5
    lim2 = float(hidden_dim) ** -0.5
    w1 = jax.random.uniform(k1, (hidden_dim, input_dim), dtype, -lim1, lim1)
    b1 = jax.random.uniform(k2, (hidden_dim,), dtype, -lim1, lim1)
    w2 = jax.random.uniform(k3, (output_dim, hidden_dim), dtype, -lim2, lim2)
    b2 = jax.random.uniform(k4, (output_dim,), dtype, -lim2, lim2)
    return w1, b1, w2, b2


def reference_forward(x, w1, b1, w2, b2):
    h = jnp.maximum(x @ w1.T + b1, 0.0)
    return h @ w2.T + b2


# TODO(synk): Linear_QNet.save() (torch.save of the state_dict) is host-side I/O
# with no Pallas equivalent; only the forward pass is implemented here.

if __name__ == "__main__":
    # Snake Q-net shapes: 11-d state, 32 hidden, 3 actions.
    batch, input_dim, hidden_dim, output_dim = 8, 11, 32, 3

    key = jax.random.PRNGKey(0)
    kx, kp, kxb = jax.random.split(key, 3)
    w1, b1, w2, b2 = init_params(kp, input_dim, hidden_dim, output_dim)
    packed, dims = pack_params(w1, b1, w2, b2)

    # --- small-batch path (no grid, whole problem VMEM-resident) ---
    x = jax.random.normal(kx, (batch, input_dim), jnp.float32)
    out = jax.block_until_ready(linear_qnet_forward(x, packed, dims))
    ref = reference_forward(x, w1, b1, w2, b2)
    assert out.shape == (batch, output_dim)
    assert jnp.allclose(out, ref, atol=1e-5, rtol=1e-5)

    # --- batch-tiled path (even "parallel" grid, lane-dense stores) ---
    big_batch = 600
    xb = jax.random.normal(kxb, (big_batch, input_dim), jnp.float32)
    outb = jax.block_until_ready(
        linear_qnet_forward(xb, packed, dims, block_b=256))
    refb = reference_forward(xb, w1, b1, w2, b2)
    assert outb.shape == (big_batch, output_dim)
    assert jnp.allclose(outb, refb, atol=1e-5, rtol=1e-5)

    print("KERNEL_OK")
</pallas_src>

<mosaic_0001>
module attributes {stable_mosaic.version = 11 : i64} {
  func.func @_qnet_kernel(%arg0: memref<11x8xf32, #tpu.memory_space<vmem>>, %arg1: memref<40x128xf32, #tpu.memory_space<vmem>>, %arg2: memref<3x8xf32, #tpu.memory_space<vmem>>) attributes {dimension_semantics = [], scalar_prefetch = 0 : i64, scratch_operands = 0 : i64, tpu.core_type = #tpu.core_type<tc>} {
    %c0 = arith.constant 0 : index
    %c0_0 = arith.constant 0 : index
    %0 = vector.load %arg1[%c0, %c0_0] : memref<40x128xf32, #tpu.memory_space<vmem>>, vector<32x11xf32>
    %c0_1 = arith.constant 0 : index
    %c127 = arith.constant 127 : index
    %1 = vector.load %arg1[%c0_1, %c127] : memref<40x128xf32, #tpu.memory_space<vmem>>, vector<32x1xf32>
    %c32 = arith.constant 32 : index
    %c0_2 = arith.constant 0 : index
    %2 = vector.load %arg1[%c32, %c0_2] : memref<40x128xf32, #tpu.memory_space<vmem>>, vector<3x32xf32>
    %c32_3 = arith.constant 32 : index
    %c127_4 = arith.constant 127 : index
    %3 = vector.load %arg1[%c32_3, %c127_4] : memref<40x128xf32, #tpu.memory_space<vmem>>, vector<3x1xf32>
    %c0_5 = arith.constant 0 : index
    %c0_6 = arith.constant 0 : index
    %4 = vector.load %arg0[%c0_5, %c0_6] : memref<11x8xf32, #tpu.memory_space<vmem>>, vector<11x8xf32>
    %cst = arith.constant dense<0.000000e+00> : vector<32x8xf32>
    %5 = tpu.matmul %0, %4, %cst {dimension_numbers = #tpu.dot_dimension_numbers<[1], [0], [0], [1], [0, 0, 1, 1], [], []>} : vector<32x11xf32>, vector<11x8xf32>, vector<32x8xf32> -> vector<32x8xf32>
    %6 = vector.broadcast %1 : vector<32x1xf32> to vector<32x8xf32>
    %7 = arith.addf %5, %6 : vector<32x8xf32>
    %cst_7 = arith.constant 0.000000e+00 : f32
    %8 = vector.broadcast %cst_7 : f32 to vector<32x8xf32>
    %9 = arith.maximumf %7, %8 : vector<32x8xf32>
    %cst_8 = arith.constant dense<0.000000e+00> : vector<3x8xf32>
    %10 = tpu.matmul %2, %9, %cst_8 {dimension_numbers = #tpu.dot_dimension_numbers<[1], [0], [0], [1], [0, 0, 1, 1], [], []>} : vector<3x32xf32>, vector<32x8xf32>, vector<3x8xf32> -> vector<3x8xf32>
    %11 = vector.broadcast %3 : vector<3x1xf32> to vector<3x8xf32>
    %12 = arith.addf %10, %11 : vector<3x8xf32>
    %c0_9 = arith.constant 0 : index
    %c0_10 = arith.constant 0 : index
    %13 = vector.load %arg2[%c0_9, %c0_10] : memref<3x8xf32, #tpu.memory_space<vmem>>, vector<3x8xf32>
    tpu.vector_store %arg2[%c0_9, %c0_10], %12 {strides = array<i32>} : memref<3x8xf32, #tpu.memory_space<vmem>>, vector<3x8xf32>,
    return
  }
}

</mosaic_0001>

<bundles_post_ra>
// kernel: tpu_custom_call.1
= control target key start
LH: loop header
LB: loop body
LE: loop exit
PB: predicated region body
PF: predicated region fallthrough
CT: control target
= control target key end

     0   :  { %7 = vsyncpa [#allocation3], 0  ;;  %s417_s0 = inlined_call_operand.vmem [shape: f32[11,8], index: 0, kind: input, shape index: {}]   ;;  %s418_s1 = inlined_call_operand.hbm [shape: f32[40,128], index: 1, kind: input, shape index: {}]   ;;  %s419_s2 = inlined_call_operand.hbm [shape: f32[3,8], index: 2, kind: output, shape index: {}]  }
   0x1   :  { %8 = vsyncpa [#allocation4], 0  ;;  %s359_s9 = smov [#allocation2]   ;;  %s311_s13 = scalar_lea.hbm %s418_s1, 640 }
   0x2   :  { %s16_s10 = sshll.u32 %s359_s9, 4  ;;  %p312_p0 = scmp.ne.s32.totalorder %s418_s1, %s311_s13  ;;  %s17_s10 = int_to_ptr.vmem [resolvable:$true] %s16_s10 }
   0x3   :  { %p315_p1 = scmp.lt.u32.totalorder %s311_s13, %s418_s1 }
   0x5   :  { %p317_p2 = pnand %p315_p1, %p312_p0 }
   0x7   :  { %320 = shalt.err (!%p317_p2)
}
   0x8   :  { %s321_s18 = scalar_lea.vmem %s17_s10, 640  ;;  %p326_p4 = scmp.lt.s32.totalorder %s17_s10, %s17_s10 }
   0x9   :  { %p322_p3 = scmp.ne.s32.totalorder %s17_s10, %s321_s18  ;;  %p327_p5 = scmp.lt.s32.totalorder %s321_s18, %s321_s18 }
   0xb   :  { %p328_p6 = por %p327_p5, %p326_p4 }
   0xd   :  { %p329_p7 = pnand %p328_p6, %p322_p3 }
   0xf   :  { %332 = shalt.err (!%p329_p7)
}
  0x10   :  { %s360_s19 = smov 128   ;;  %s361_s20 = smov 8  }
  0x11   :  { %22 = dma.hbm_to_vmem [thread:$0]  %s418_s1, 640, %s17_s10, [#allocation3], %s360_s19, %s360_s19, %s361_s20  }
  0x12   :  { %355 = dma.done.wait [#allocation3], 640  }
  0x13   :  { %356 = vsyncadd [#allocation3], 4294966656  ;;  %v362_v0 = vmov 127   ;;  %vm62_vm0 = vcmask 1042432   ;;  %vm53_vm1 = vcmask 89088   ;;  %vm363_vm2 = vmmov 1  }
  0x14   :  { %309 = vset.pattern.permute.xlu0 %v362_v0  ;;  %310 = vset.pattern.permute.xlu1 %v362_v0  ;;  %vm289_vm3 = vmpackc.low %vm62_vm0, %vm363_vm2  ;;  %v31_v1 = vld [vmem:[%s417_s0] sm:$0xff]  ;;  %v32_v2 = vld [vmem:[%s417_s0 + $0x8] sm:$0x7]  ;;  %v364_v9 = vmov 0.0|0.0   ;;  %vm365_vm4 = vmmov 0   ;;  %v366_v10 = vmov 0.0  }
  0x15   :  { %v26_v3 = vld [vmem:[#allocation2] sm:$0xff]  ;;  %v288_v4 = vpack.c.bf16 %v32_v2, %v31_v1  ;;  %v28_v5 = vld [vmem:[#allocation2 + $0x10] sm:$0xff]  ;;  %v27_v6 = vld [vmem:[#allocation2 + $0x8] sm:$0xff]  ;;  %294 = vmatprep.subr.bf16.mxu1 %v364_v9  ;;  %285 = vmatprep.mubr.msk.f32.mxu1 %vm365_vm4, %v366_v10  ;;  %vm160_vm5 = vcmask 261120   ;;  %s367_s0 = smov [#allocation5]   ;;  %vm233_vm6 = vcmask 59392  }
  0x16   :  { %271 = vmatprep.mubr.msk.f32.mxu0 %vm53_vm1, %v26_v3  ;;  %35 = vperm.xlu0 %309, %v26_v3   ;;  %v29_v7 = vld [vmem:[#allocation2 + $0x18] sm:$0xff]  ;;  %v30_v8 = vld [vmem:[#allocation2 + $0x20] sm:$0x7]  ;;  %s241_s1 = sshll.u32 %s367_s0, 4  ;;  %s242_s1 = int_to_ptr.vmem [resolvable:$true] %s241_s1 }
  0x17   :  { %45 = vperm.xlu1 %310, %v28_v5   ;;  %290 = vmatprep.subr.msk.bf16.mxu0 %vm289_vm3, %v288_v4  ;;  %s333_s27 = scalar_lea.vmem %s242_s1, 64  ;;  %p338_p9 = scmp.lt.s32.totalorder %s242_s1, %s242_s1 }
  0x18   :  { %293 = vmatpush3.bf16.msk.msra.mxu0 %vm289_vm3, %v288_v4  ;;  %p334_p8 = scmp.ne.s32.totalorder %s242_s1, %s333_s27  ;;  %p339_p10 = scmp.lt.s32.totalorder %s333_s27, %s333_s27 }
  0x1a   :  { %40 = vperm.xlu0 %309, %v27_v6   ;;  %p340_p11 = por %p339_p10, %p338_p9 }
  0x1b   :  { %50 = vperm.xlu1 %310, %v29_v7   ;;  %272 = vmatmul.mubr.msk.f32.vlgmr.msra.gmra.mrb[0].mxu0 %vm53_vm1, %v27_v6 }
  0x1c   :  { %274 = vmatprep.mubr.msk.f32.mxu0 %vm53_vm1, %v28_v5  ;;  %p341_p12 = pnand %p340_p11, %p334_p8 }
  0x1e   :  { %157 = vperm.xlu0 %309, %v30_v8  }
  0x1f   :  { %275 = vmatmul.mubr.msk.f32.gmra.mrb[2].mxu0 %vm53_vm1, %v29_v7 }
  0x95   :  { %v36_v11 = vpop.permute.xlu0 %35 }
  0x96   :  { %v46_v12 = vpop.permute.xlu1 %45 }
  0x99   :  { %v41_v13 = vpop.permute.xlu0 %40 }
  0x9a   :  { %v51_v19 = vpop.permute.xlu1 %50 }
  0x9d   :  { %v158_v29 = vpop.permute.xlu0 %157 }
  0xee   :  { %v273_v14 = vpop.f32.mrb[0].mxu0 }
  0xef   :  { %v138_v15 = vadd.f32 %v273_v14, %v41_v13  ;;  %v132_v16 = vpop.f32.mrb[1].mxu0 }
  0xf0   :  { %v133_v17 = vadd.f32 %v132_v16, %v36_v11 }
  0xf1   :  { %v152_v18 = vmax.f32 %v138_v15, 0.0 }
  0xf2   :  { %v151_v20 = vmax.f32 %v133_v17, 0.0  ;;  %v276_v21 = vpop.f32.mrb[2].mxu0 }
  0xf3   :  { %v148_v22 = vadd.f32 %v276_v21, %v51_v19  ;;  %v142_v23 = vpop.f32.mrb[3].mxu0 }
  0xf4   :  { %v143_v24 = vadd.f32 %v142_v23, %v46_v12  ;;  %v295_v25 = vpack.c.bf16 %v152_v18, %v151_v20 }
  0xf5   :  { %v154_v26 = vmax.f32 %v148_v22, 0.0 }
  0xf6   :  { %v153_v27 = vmax.f32 %v143_v24, 0.0  ;;  %296 = vmatpush3.bf16.msra.mxu1 %v295_v25 }
  0xf7   :  { %297 = vmatprep.subr.bf16.mxu1 %v364_v9 }
  0xf8   :  { %v298_v28 = vpack.c.bf16 %v154_v26, %v153_v27 }
  0xfa   :  { %299 = vmatpush3.bf16.msra.mxu1 %v298_v28 }
  0xfd   :  { %286 = vmatmul.mubr.msk.f32.vlgmr.msra.gmra.mrb[0].mxu1 %vm160_vm5, %v30_v8 }
 0x1d0   :  { %v229_v30 = vpop.f32.mrb[0].mxu1 }
 0x1d1   :  { %v230_v31 = vadd.f32 %v229_v30, %v158_v29  ;;  %v287_v32 = vpop.f32.mrb[1].mxu1 }
 0x1d3   :  { %234 = vst.msk [vmem:[#allocation5] sm:$0x7] %vm233_vm6, %v230_v31 }
 0x1d4   :  { %344 = shalt.err (!%p341_p12)
}
 0x1d5   :  { %s345_s30 = scalar_lea.hbm %s419_s2, 64 }
 0x1d6   :  { %p346_p13 = scmp.ne.s32.totalorder %s419_s2, %s345_s30  ;;  %p349_p0 = scmp.lt.u32.totalorder %s345_s30, %s419_s2 }
 0x1d8   :  { %p351_p1 = pnand %p349_p0, %p346_p13 }
 0x1da   :  { %354 = shalt.err (!%p351_p1)
}
 0x1db   :  { %244 = dma.vmem_to_hbm [thread:$0]  %s242_s1, 64, %s419_s2, [#allocation4]  }
 0x1dc   :  { %357 = dma.done.wait [#allocation4], 64  }
 0x1dd   :  { %358 = vsyncadd [#allocation4], 4294967232 }
 0x1de   :  { %248 = vsyncpa [#allocation3], 1 }
 0x1df   :  { %249 = vsyncpa [#allocation4], 1 }

</bundles_post_ra>
